<compile_context>
chip_gen: v7x
topology: tpu7x:2x2x1
jax: 0.10.0
libtpu: 0.0.40
codegen_flags: <defaults>
</compile_context>

<pallas_src>
import functools

import jax
import jax.numpy as jnp
from jax.experimental import pallas as pl
from jax.experimental.pallas import tpu as pltpu

_NEG = -1e30  # finite "minus infinity" used to mask the class tail


def _round_up(x: int, m: int) -> int:
    return ((x + m - 1) // m) * m


def _make_ce_kernel(n_valid: int, n_classes: int, tn: int, tc: int):
    """Build the cross-entropy kernel with true N / C / tile sizes baked in."""
    class_tail = (n_classes % tc) != 0  # static: does any class tile overhang C?

    def kernel(logits_ref, targets_ref, loss_ref, m_sc, l_sc, t_sc):
        i = pl.program_id(0)           # row-tile index   ("parallel")
        j = pl.program_id(1)           # class-tile index ("arbitrary", reduction)
        nj = pl.num_programs(1)

        @pl.when(j == 0)
        def _init():
            m_sc[...] = jnp.full_like(m_sc, -jnp.inf)
            l_sc[...] = jnp.zeros_like(l_sc)
            t_sc[...] = jnp.zeros_like(t_sc)

        x = logits_ref[...]            # [tn, tc], native dtype (f32 or bf16)
        tgt = targets_ref[...]         # [tn, 1] int32

        # (1, tc) local column ids -> broadcast compares; avoids materializing a
        # full (tn, tc) int32 iota + add per element.
        local_ids = jax.lax.broadcasted_iota(jnp.int32, (1, tc), 1)

        if class_tail:
            # Mask undefined garbage of the class-tail edge block *before* the
            # max/exp path (select, not add, so NaN/Inf garbage never propagates).
            valid = local_ids < (n_classes - j * tc)              # (1, tc) bool
            x = jnp.where(valid, x, jnp.asarray(_NEG, dtype=x.dtype))

        # ---- online softmax statistics across class tiles ----
        # Tile max in native dtype is exact; upcast only the exp/denominator path.
        m_prev = m_sc[...]
        tile_max = jnp.max(x, axis=-1, keepdims=True).astype(jnp.float32)
        m_new = jnp.maximum(m_prev, tile_max)
        alpha = jnp.exp(m_prev - m_new)
        e = jnp.exp(x.astype(jnp.float32) - m_new)
        # TODO(synk): trust Mosaic to fuse the astype/sub/exp chain into the
        #             reduction; chunk the class dim in-kernel if a bundle dump
        #             shows tile-sized f32 temporaries.
        l_sc[...] = alpha * l_sc[...] + jnp.sum(e, axis=-1, keepdims=True)
        m_sc[...] = m_new

        # ---- running target logit: select + sum in native dtype (exact, one
        #      nonzero per row), accumulate in f32 ----
        hit = local_ids == (tgt - j * tc)                          # (tn, tc) bool
        tsel = jnp.where(hit, x, jnp.zeros((), dtype=x.dtype))
        t_sc[...] += jnp.sum(tsel, axis=-1, keepdims=True).astype(jnp.float32)

        @pl.when(j == nj - 1)
        def _finalize():
            per_row = (m_sc[...] + jnp.log(l_sc[...])) - t_sc[...]  # [tn, 1]
            row_ids = i * tn + jax.lax.broadcasted_iota(jnp.int32, (tn, 1), 0)
            # Zero padded rows of a partial edge tile (writeback is clamped to
            # N anyway; this keeps the JAX-side sum exact and NaN-free).
            loss_ref[...] = jnp.where(row_ids < n_valid, per_row, 0.0)

    return kernel


@functools.partial(jax.jit, static_argnames=("block_n", "block_c"))
def cross_entropy_loss(logits: jax.Array, targets: jax.Array,
                       *, block_n: int = 512, block_c: int = 2048) -> jax.Array:
    """Mean cross-entropy over a batch, computed in a tiled Pallas TPU kernel.

    logits:  [N, C] float32 or bfloat16 (consumed unpadded, in native dtype)
    targets: [N]    integer class indices in [0, C)
    returns: scalar float32
    """
    n, c = logits.shape
    assert block_n % 8 == 0 and block_c % 128 == 0

    # Class tile: whole class dim if it fits (block == array dim is always
    # legal), else a multiple-of-128 tile with in-kernel tail masking.
    tc = c if c <= block_c else block_c

    # Row tile: multiple of 8; give the "parallel" row axis >= 2 tiles whenever
    # possible so both v7x TensorCores get work.
    tn = min(block_n, _round_up(n, 8))
    if pl.cdiv(n, tn) < 2 and n > 8:
        tn = _round_up(pl.cdiv(n, 2), 8)

    grid = (pl.cdiv(n, tn), pl.cdiv(c, tc))

    targets2d = targets.astype(jnp.int32).reshape(n, 1)

    per_row = pl.pallas_call(
        _make_ce_kernel(n, c, tn, tc),
        out_shape=jax.ShapeDtypeStruct((n, 1), jnp.float32),
        grid_spec=pltpu.PrefetchScalarGridSpec(
            num_scalar_prefetch=0,
            grid=grid,
            in_specs=[
                pl.BlockSpec((tn, tc), lambda i, j: (i, j)),   # logits tile
                pl.BlockSpec((tn, 1), lambda i, j: (i, 0)),    # targets tile
            ],
            out_specs=pl.BlockSpec((tn, 1), lambda i, j: (i, 0)),
            scratch_shapes=[
                pltpu.VMEM((tn, 1), jnp.float32),   # running max  m
                pltpu.VMEM((tn, 1), jnp.float32),   # running sum  l
                pltpu.VMEM((tn, 1), jnp.float32),   # running target logit t
            ],
        ),
        compiler_params=pltpu.CompilerParams(
            dimension_semantics=("parallel", "arbitrary"),
            # 48 MiB: safe on v7x (64 MiB physical VMEM), ample headroom for
            # 2x-buffered input tiles + f32 elementwise temporaries.
            vmem_limit_bytes=48 * 1024 * 1024,
        ),
    )(logits, targets2d)

    # Rows beyond N are never written back (clamped) / zeroed in-kernel.
    return jnp.sum(per_row) / jnp.float32(n)


def _reference(logits, targets):
    logp = jax.nn.log_softmax(logits.astype(jnp.float32), axis=-1)
    return -jnp.mean(logp[jnp.arange(logits.shape[0]), targets])


if __name__ == "__main__":
    key = jax.random.PRNGKey(0)
    k1, k2, k3, k4, k5, k6 = jax.random.split(key, 6)

    # Test 1: small single-tile case (class block == full class dim, C=32).
    N1, C1 = 8, 32
    logits1 = jax.random.normal(k1, (N1, C1), dtype=jnp.float32)
    targets1 = jax.random.randint(k2, (N1,), 0, C1, dtype=jnp.int32)
    loss1 = jax.block_until_ready(cross_entropy_loss(logits1, targets1))
    ref1 = _reference(logits1, targets1)
    assert jnp.allclose(loss1, ref1, atol=1e-5, rtol=1e-5), (loss1, ref1)

    # Test 2: multi-tile grid (4 row tiles x 2 class tiles, online softmax).
    N2, C2 = 64, 256
    logits2 = jax.random.normal(k3, (N2, C2), dtype=jnp.float32)
    targets2 = jax.random.randint(k4, (N2,), 0, C2, dtype=jnp.int32)
    loss2 = jax.block_until_ready(
        cross_entropy_loss(logits2, targets2, block_n=16, block_c=128))
    ref2 = _reference(logits2, targets2)
    assert jnp.allclose(loss2, ref2, atol=1e-4, rtol=1e-4), (loss2, ref2)

    # Test 3: bf16 logits consumed directly; upcast happens inside the kernel.
    logits3 = logits2.astype(jnp.bfloat16)
    loss3 = jax.block_until_ready(
        cross_entropy_loss(logits3, targets2, block_n=16, block_c=128))
    ref3 = _reference(logits3, targets2)
    assert jnp.allclose(loss3, ref3, atol=5e-2, rtol=5e-2), (loss3, ref3)

    # Test 4: ragged shapes (partial row AND class edge blocks -> in-kernel
    # tail masking instead of wrapper-side padding).
    N4, C4 = 50, 200
    logits4 = jax.random.normal(k5, (N4, C4), dtype=jnp.float32)
    targets4 = jax.random.randint(k6, (N4,), 0, C4, dtype=jnp.int32)
    loss4 = jax.block_until_ready(
        cross_entropy_loss(logits4, targets4, block_n=16, block_c=128))
    ref4 = _reference(logits4, targets4)
    assert jnp.allclose(loss4, ref4, atol=1e-4, rtol=1e-4), (loss4, ref4)

    # Test 5: default block sizes -> wrapper shrinks tn so the parallel row
    # axis still has 2 tiles (megacore path).
    loss5 = jax.block_until_ready(cross_entropy_loss(logits2, targets2))
    assert jnp.allclose(loss5, ref2, atol=1e-4, rtol=1e-4), (loss5, ref2)

    print("KERNEL_OK")
</pallas_src>

<mosaic_0001>
module attributes {stable_mosaic.version = 11 : i64} {
  func.func @kernel(%arg0: i32, %arg1: i32, %arg2: memref<8x32xf32, #tpu.memory_space<vmem>>, %arg3: memref<8x1xi32, #tpu.memory_space<vmem>>, %arg4: memref<8x1xf32, #tpu.memory_space<vmem>>, %arg5: memref<8x1xf32, #tpu.memory_space<vmem>>, %arg6: memref<8x1xf32, #tpu.memory_space<vmem>>, %arg7: memref<8x1xf32, #tpu.memory_space<vmem>>) attributes {dimension_semantics = [#tpu.dimension_semantics<parallel>, #tpu.dimension_semantics<arbitrary>], iteration_bounds = array<i64: 1, 1>, scalar_prefetch = 0 : i64, scratch_operands = 3 : i64, tpu.core_type = #tpu.core_type<tc>, window_params = [{transform_indices = @transform_0, window_bounds = array<i64: 8, 32>}, {transform_indices = @transform_1, window_bounds = array<i64: 8, 1>}, {transform_indices = @transform_2, window_bounds = array<i64: 8, 1>}]} {
    %c0_i32 = arith.constant 0 : i32
    %0 = arith.cmpi eq, %arg1, %c0_i32 : i32
    %1 = arith.extui %0 : i1 to i32
    %c0_i32_0 = arith.constant 0 : i32
    %2 = arith.cmpi ne, %1, %c0_i32_0 : i32
    scf.if %2 {
      %cst_21 = arith.constant 0xFF800000 : f32
      %38 = vector.broadcast %cst_21 : f32 to vector<8x1xf32>
      %c0_22 = arith.constant 0 : index
      %c0_23 = arith.constant 0 : index
      %39 = vector.load %arg5[%c0_22, %c0_23] : memref<8x1xf32, #tpu.memory_space<vmem>>, vector<8x1xf32>
      tpu.vector_store %arg5[%c0_22, %c0_23], %38 {strides = array<i32>} : memref<8x1xf32, #tpu.memory_space<vmem>>, vector<8x1xf32>,
      %cst_24 = arith.constant 0.000000e+00 : f32
      %40 = vector.broadcast %cst_24 : f32 to vector<8x1xf32>
      %c0_25 = arith.constant 0 : index
      %c0_26 = arith.constant 0 : index
      %41 = vector.load %arg6[%c0_25, %c0_26] : memref<8x1xf32, #tpu.memory_space<vmem>>, vector<8x1xf32>
      tpu.vector_store %arg6[%c0_25, %c0_26], %40 {strides = array<i32>} : memref<8x1xf32, #tpu.memory_space<vmem>>, vector<8x1xf32>,
      %cst_27 = arith.constant 0.000000e+00 : f32
      %42 = vector.broadcast %cst_27 : f32 to vector<8x1xf32>
      %c0_28 = arith.constant 0 : index
      %c0_29 = arith.constant 0 : index
      %43 = vector.load %arg7[%c0_28, %c0_29] : memref<8x1xf32, #tpu.memory_space<vmem>>, vector<8x1xf32>
      tpu.vector_store %arg7[%c0_28, %c0_29], %42 {strides = array<i32>} : memref<8x1xf32, #tpu.memory_space<vmem>>, vector<8x1xf32>,
    } else {
    }
    %c0 = arith.constant 0 : index
    %c0_1 = arith.constant 0 : index
    %3 = vector.load %arg2[%c0, %c0_1] : memref<8x32xf32, #tpu.memory_space<vmem>>, vector<8x32xf32>
    %c0_2 = arith.constant 0 : index
    %c0_3 = arith.constant 0 : index
    %4 = vector.load %arg3[%c0_2, %c0_3] : memref<8x1xi32, #tpu.memory_space<vmem>>, vector<8x1xi32>
    %5 = tpu.iota {dimensions = array<i32: 1>} : vector<1x32xi32>
    %c0_4 = arith.constant 0 : index
    %c0_5 = arith.constant 0 : index
    %6 = vector.load %arg5[%c0_4, %c0_5] : memref<8x1xf32, #tpu.memory_space<vmem>>, vector<8x1xf32>
    %cst = arith.constant dense<0xFF800000> : vector<8xf32>
    %7 = vector.multi_reduction <maximumf>, %3, %cst [1] : vector<8x32xf32> to vector<8xf32>
    %8 = vector.shape_cast %7 : vector<8xf32> to vector<8x1xf32>
    %9 = arith.maximumf %6, %8 : vector<8x1xf32>
    %10 = arith.subf %6, %9 : vector<8x1xf32>
    %11 = math.exp %10 : vector<8x1xf32>
    %12 = vector.broadcast %9 : vector<8x1xf32> to vector<8x32xf32>
    %13 = arith.subf %3, %12 : vector<8x32xf32>
    %14 = math.exp %13 : vector<8x32xf32>
    %c0_6 = arith.constant 0 : index
    %c0_7 = arith.constant 0 : index
    %15 = vector.load %arg6[%c0_6, %c0_7] : memref<8x1xf32, #tpu.memory_space<vmem>>, vector<8x1xf32>
    %16 = arith.mulf %11, %15 : vector<8x1xf32>
    %cst_8 = arith.constant dense<0.000000e+00> : vector<8xf32>
    %17 = vector.multi_reduction <add>, %14, %cst_8 [1] : vector<8x32xf32> to vector<8xf32>
    %18 = vector.shape_cast %17 : vector<8xf32> to vector<8x1xf32>
    %19 = arith.addf %16, %18 : vector<8x1xf32>
    %c0_9 = arith.constant 0 : index
    %c0_10 = arith.constant 0 : index
    %20 = vector.load %arg6[%c0_9, %c0_10] : memref<8x1xf32, #tpu.memory_space<vmem>>, vector<8x1xf32>
    tpu.vector_store %arg6[%c0_9, %c0_10], %19 {strides = array<i32>} : memref<8x1xf32, #tpu.memory_space<vmem>>, vector<8x1xf32>,
    %c0_11 = arith.constant 0 : index
    %c0_12 = arith.constant 0 : index
    %21 = vector.load %arg5[%c0_11, %c0_12] : memref<8x1xf32, #tpu.memory_space<vmem>>, vector<8x1xf32>
    tpu.vector_store %arg5[%c0_11, %c0_12], %9 {strides = array<i32>} : memref<8x1xf32, #tpu.memory_space<vmem>>, vector<8x1xf32>,
    %c32_i32 = arith.constant 32 : i32
    %22 = arith.muli %arg1, %c32_i32 : i32
    %23 = vector.broadcast %22 : i32 to vector<8x1xi32>
    %24 = arith.subi %4, %23 : vector<8x1xi32>
    %25 = vector.broadcast %5 : vector<1x32xi32> to vector<8x32xi32>
    %26 = vector.broadcast %24 : vector<8x1xi32> to vector<8x32xi32>
    %27 = arith.cmpi eq, %25, %26 : vector<8x32xi32>
    %cst_13 = arith.constant 0.000000e+00 : f32
    %28 = vector.broadcast %cst_13 : f32 to vector<8x32xf32>
    %29 = arith.select %27, %3, %28 : vector<8x32xi1>, vector<8x32xf32>
    %c0_14 = arith.constant 0 : index
    %c0_15 = arith.constant 0 : index
    %30 = vector.load %arg7[%c0_14, %c0_15] : memref<8x1xf32, #tpu.memory_space<vmem>>, vector<8x1xf32>
    %cst_16 = arith.constant dense<0.000000e+00> : vector<8xf32>
    %31 = vector.multi_reduction <add>, %29, %cst_16 [1] : vector<8x32xf32> to vector<8xf32>
    %32 = vector.shape_cast %31 : vector<8xf32> to vector<8x1xf32>
    %33 = arith.addf %30, %32 : vector<8x1xf32>
    %c0_17 = arith.constant 0 : index
    %c0_18 = arith.constant 0 : index
    %34 = vector.load %arg7[%c0_17, %c0_18] : memref<8x1xf32, #tpu.memory_space<vmem>>, vector<8x1xf32>
    tpu.vector_store %arg7[%c0_17, %c0_18], %33 {strides = array<i32>} : memref<8x1xf32, #tpu.memory_space<vmem>>, vector<8x1xf32>,
    %c0_i32_19 = arith.constant 0 : i32
    %35 = arith.cmpi eq, %arg1, %c0_i32_19 : i32
    %36 = arith.extui %35 : i1 to i32
    %c0_i32_20 = arith.constant 0 : i32
    %37 = arith.cmpi ne, %36, %c0_i32_20 : i32
    scf.if %37 {
      %c0_21 = arith.constant 0 : index
      %c0_22 = arith.constant 0 : index
      %38 = vector.load %arg5[%c0_21, %c0_22] : memref<8x1xf32, #tpu.memory_space<vmem>>, vector<8x1xf32>
      %c0_23 = arith.constant 0 : index
      %c0_24 = arith.constant 0 : index
      %39 = vector.load %arg6[%c0_23, %c0_24] : memref<8x1xf32, #tpu.memory_space<vmem>>, vector<8x1xf32>
      %40 = math.log %39 : vector<8x1xf32>
      %41 = arith.addf %38, %40 : vector<8x1xf32>
      %c0_25 = arith.constant 0 : index
      %c0_26 = arith.constant 0 : index
      %42 = vector.load %arg7[%c0_25, %c0_26] : memref<8x1xf32, #tpu.memory_space<vmem>>, vector<8x1xf32>
      %43 = arith.subf %41, %42 : vector<8x1xf32>
      %c8_i32 = arith.constant 8 : i32
      %44 = arith.muli %arg0, %c8_i32 : i32
      %45 = tpu.iota {dimensions = array<i32: 0>} : vector<8x1xi32>
      %46 = vector.broadcast %44 : i32 to vector<8x1xi32>
      %47 = arith.addi %46, %45 : vector<8x1xi32>
      %c8_i32_27 = arith.constant 8 : i32
      %48 = vector.broadcast %c8_i32_27 : i32 to vector<8x1xi32>
      %49 = arith.cmpi slt, %47, %48 : vector<8x1xi32>
      %cst_28 = arith.constant 0.000000e+00 : f32
      %50 = vector.broadcast %cst_28 : f32 to vector<8x1xf32>
      %51 = arith.select %49, %43, %50 : vector<8x1xi1>, vector<8x1xf32>
      %c0_29 = arith.constant 0 : index
      %c0_30 = arith.constant 0 : index
      %52 = vector.load %arg4[%c0_29, %c0_30] : memref<8x1xf32, #tpu.memory_space<vmem>>, vector<8x1xf32>
      tpu.vector_store %arg4[%c0_29, %c0_30], %51 {strides = array<i32>} : memref<8x1xf32, #tpu.memory_space<vmem>>, vector<8x1xf32>,
    } else {
    }
    return
  }
  func.func @transform_0(%arg0: i32, %arg1: i32) -> (i32, i32) {
    %c0_i32 = arith.constant 0 : i32
    return %arg0, %arg1 : i32, i32
  }
  func.func @transform_1(%arg0: i32, %arg1: i32) -> (i32, i32) {
    %c0_i32 = arith.constant 0 : i32
    %c0_i32_0 = arith.constant 0 : i32
    return %arg0, %c0_i32 : i32, i32
  }
  func.func @transform_2(%arg0: i32, %arg1: i32) -> (i32, i32) {
    %c0_i32 = arith.constant 0 : i32
    %c0_i32_0 = arith.constant 0 : i32
    return %arg0, %c0_i32 : i32, i32
  }
}

</mosaic_0001>

<bundles_post_ra>
// kernel: cross_entropy_loss.1
= control target key start
LH: loop header
LB: loop body
LE: loop exit
PB: predicated region body
PF: predicated region fallthrough
CT: control target
= control target key end

     0   :  { %vm24_vm0 = vcmask 261120   ;;  %vm15_vm1 = vcmask 7168   ;;  %v96_v1 = vmov -inf   ;;  %v97_v3 = vmov 0   ;;  %s133_s0 = inlined_call_operand.vmem [shape: f32[8,32], index: 0, kind: input, shape index: {}]   ;;  %s134_s1 = inlined_call_operand.vmem [shape: s32[8,1], index: 1, kind: input, shape index: {}]   ;;  %s135_s2 = inlined_call_operand.vmem [shape: f32[8,1], index: 2, kind: output, shape index: {}]  }
   0x1   :  { %v19_v0 = vld [vmem:[%s133_s0] sm:$0xff]  ;;  %16 = vst.msk [vmem:[#allocation2] sm:$0xff] %vm15_vm1, %v96_v1  ;;  %88 = vset.pattern.permute.xlu0 %v97_v3  ;;  %89 = vset.pattern.permute.xlu1 %v97_v3  ;;  %v98_v4 = vmov 0.0   ;;  %v21_v13 = vlaneseq }
   0x2   :  { %v25_v2 = vsel %vm24_vm0, %v19_v0, -inf  ;;  %17 = vst.msk [vmem:[#allocation3] sm:$0xff] %vm15_vm1, %v98_v4  ;;  %18 = vst.msk [vmem:[#allocation4] sm:$0xff] %vm15_vm1, %v98_v4  ;;  %v20_v5 = vld [vmem:[%s134_s1] sm:$0xff] }
   0x3   :  { %26 = vmax.xlane.f32.xlu0 %v25_v2  ;;  %53 = vperm.xlu1 %89, %v20_v5   ;;  %v22_v14 = vand.u32 127, %v21_v13 }
   0x8   :  { %v23_v6 = vld [vmem:[#allocation2] sm:$0xff] }
   0x9   :  { %v40_v22 = vld [vmem:[#allocation3] sm:$0xff]  ;;  %v57_v26 = vld [vmem:[#allocation4] sm:$0xff] }
  0x82   :  { %v54_v15 = vpop.permute.xlu1 %53 }
  0x83   :  { %vm55_vm2 = vcmp.eq.s32.totalorder %v22_v14, %v54_v15 }
  0x84   :  { %v56_v17 = vsel %vm55_vm2, %v19_v0, 0.0 }
  0x85   :  { %v58_v19 = vsel %vm24_vm0, %v56_v17, 0.0 }
  0x90   :  { %v27_v7 = vpop.xlane.xlu0 %26 }
  0x91   :  { %v28_v8 = vmax.f32 %v23_v6, %v27_v7 }
  0x93   :  { %v29_v9 = vsub.f32 %v23_v6, %v28_v8  ;;  %48 = vst.msk [vmem:[#allocation2] sm:$0xff] %vm15_vm1, %v28_v8  ;;  %34 = vperm.xlu0 %88, %v28_v8  }
  0x95   :  { %v30_v20 = vmul.f32 1.442695, %v29_v9 }
  0x9a   :  { %v66_v32 = vld [vmem:[#allocation2] sm:$0xff] }
 0x112   :  { %v35_v10 = vpop.permute.xlu0 %34 }
 0x113   :  { %v37_v11 = vsub.f32 %v19_v0, %v35_v10 }
 0x115   :  { %v38_v12 = vmul.f32 1.442695, %v37_v11 }
 0x117   :  { %90 = vpow2.f32 %v38_v12 }
 0x118   :  { %92 = vpow2.f32 %v30_v20 }
 0x121   :  { %v91_v16 = vpop.eup %90 }
 0x122   :  { %v42_v18 = vsel %vm24_vm0, %v91_v16, 0.0  ;;  %v93_v21 = vpop.eup %92 }
 0x123   :  { %43 = vadd.xlane.f32.xlu1 %v42_v18  ;;  %v41_v23 = vmul.f32 %v93_v21, %v40_v22 }
 0x127   :  { %59 = vadd.xlane.f32.xlu1 %v58_v19 }
 0x1b0   :  { %v44_v24 = vpop.xlane.xlu1 %43 }
 0x1b1   :  { %v45_v25 = vadd.f32 %v44_v24, %v41_v23 }
 0x1b3   :  { %47 = vst.msk [vmem:[#allocation3] sm:$0xff] %vm15_vm1, %v45_v25 }
 0x1b4   :  { %v60_v27 = vpop.xlane.xlu1 %59 }
 0x1b5   :  { %v61_v28 = vadd.f32 %v60_v27, %v57_v26 }
 0x1b7   :  { %62 = vst.msk [vmem:[#allocation4] sm:$0xff] %vm15_vm1, %v61_v28 }
 0x1ba   :  { %v67_v29 = vld [vmem:[#allocation3] sm:$0xff] }
 0x1bb   :  { %94 = vlog2.f32 %v67_v29 }
 0x1be   :  { %v71_v33 = vld [vmem:[#allocation4] sm:$0xff] }
 0x1c5   :  { %v95_v30 = vpop.eup %94 }
 0x1c6   :  { %v69_v31 = vmul.f32 0.6931472, %v95_v30 }
 0x1c8   :  { %v70_v34 = vadd.f32 %v69_v31, %v66_v32 }
 0x1ca   :  { %v72_v35 = vsub.f32 %v70_v34, %v71_v33 }
 0x1cc   :  { %80 = vst.msk [vmem:[%s135_s2] sm:$0xff] %vm15_vm1, %v72_v35 }

</bundles_post_ra>
